<compile_context>
chip_gen: v5e
topology: v5e:2x2
jax: 0.10.0
libtpu: 0.0.40
codegen_flags: <defaults>
</compile_context>

<pallas_src>
import functools

import numpy as np
import jax
import jax.numpy as jnp
from jax.experimental import pallas as pl
from jax.experimental.pallas import tpu as pltpu


def _bilinear_up2_matrix(n: int) -> np.ndarray:
    """(2n, n) matrix M s.t. M @ v is the 2x bilinear upsample of v (align_corners=False)."""
    m = np.zeros((2 * n, n), dtype=np.float32)
    for r in range(n):
        m[2 * r, r] += 0.75
        m[2 * r, max(r - 1, 0)] += 0.25          # clamped shift (boundary -> weight 1.0)
        m[2 * r + 1, r] += 0.75
        m[2 * r + 1, min(r + 1, n - 1)] += 0.25
    return m


def _skip_upsample_kernel(x_ref, y_ref, w_ref, k_ref, o_ref, *, nb):
    # Per batch element of this block (nb is a small static constant, typically 1-8):
    #   conv = W @ X        (Cout, Cin) @ (Cin, HW)   1x1 conv, commuted before the upsample
    #   up   = conv @ K     (Cout, HW)  @ (HW, 4HW)   bilinear x2 as one Kronecker matmul
    #   out  = up + y       skip add, dense lane store of width 4HW (multiple of 128)
    for b in range(nb):
        conv = jnp.dot(w_ref[...], x_ref[b], preferred_element_type=jnp.float32)
        up = jnp.dot(conv.astype(k_ref.dtype), k_ref[...],
                     preferred_element_type=jnp.float32)
        o_ref[b] = (up + y_ref[b].astype(jnp.float32)).astype(o_ref.dtype)


def _choose_batch_block(n, per_batch_bytes, target_bytes=4 << 20):
    """Largest divisor NB of n s.t. the block stays small AND >=2 grid steps remain (v7x TCs)."""
    best = 1
    for nb in range(1, n + 1):
        if n % nb:
            continue
        if nb * per_batch_bytes > target_bytes:
            break
        if n // nb < 2 and n >= 2:
            break
        best = nb
    return best


def skip_upsample(x, y, weight):
    """x: (N, Cin, H, W), y: (N, Cout, 2H, 2W), weight: (Cout, Cin, 1, 1). NCHW in/out."""
    n, cin, h, w = x.shape
    cout = weight.shape[0]
    oh, ow = 2 * h, 2 * w
    hw, ohw = h * w, oh * ow

    # PyTorch branch: if y's spatial shape differs, bilinearly resize it (glue, not hot path).
    if y.shape[2:] != (oh, ow):
        y = jax.image.resize(y, (y.shape[0], y.shape[1], oh, ow), method="bilinear")

    out_dtype = jnp.result_type(x.dtype, y.dtype)
    const_dtype = jnp.bfloat16 if x.dtype == jnp.bfloat16 else jnp.float32

    # Lane-dense flattened-spatial layouts (contiguous -> free reshapes in HBM).
    x_flat = x.reshape(n, cin, hw)
    y_flat = y.reshape(n, cout, ohw)

    w2d = jnp.asarray(weight.reshape(cout, cin), dtype=const_dtype)

    # Bilinear x2 upsample (half-pixel / align_corners=False) as ONE constant matrix:
    #   out_flat = conv_flat @ K,   K = kron(M_h^T, M_w^T),   M_n = (2n, n) 1-D upsampler.
    k_np = np.kron(_bilinear_up2_matrix(h).T, _bilinear_up2_matrix(w).T)   # (HW, 4HW)
    k_mat = jnp.asarray(k_np, dtype=const_dtype)
    # TODO(synk): for large H*W (K no longer fits VMEM, roughly HW > ~2-4K) switch to the
    # separable A_row/A_col two-flat-dot fallback with a spatial grid axis tiling the 4HW
    # lane dim (>=512 lanes per tile) and a correspondingly raised vmem_limit_bytes.

    per_batch_bytes = 4 * (cin * hw + 2 * cout * ohw)       # x block + y block + out block
    nb = _choose_batch_block(n, per_batch_bytes)

    # Explicit scoped-VMEM budget: double-buffered blocks + resident constants, with headroom.
    blk_bytes = nb * per_batch_bytes
    const_bytes = 4 * (cout * cin + hw * ohw)
    vmem_limit = int(min(max(4 * blk_bytes + 2 * const_bytes + (8 << 20), 32 << 20), 64 << 20))

    kernel = functools.partial(_skip_upsample_kernel, nb=nb)

    out_flat = pl.pallas_call(
        kernel,
        out_shape=jax.ShapeDtypeStruct((n, cout, ohw), out_dtype),
        grid_spec=pltpu.PrefetchScalarGridSpec(
            num_scalar_prefetch=0,
            grid=(n // nb,),
            in_specs=[
                pl.BlockSpec((nb, cin, hw), lambda b: (b, 0, 0)),
                pl.BlockSpec((nb, cout, ohw), lambda b: (b, 0, 0)),
                pl.BlockSpec((cout, cin), lambda b: (0, 0)),   # constant index map: stays resident
                pl.BlockSpec((hw, ohw), lambda b: (0, 0)),     # constant index map: stays resident
            ],
            out_specs=pl.BlockSpec((nb, cout, ohw), lambda b: (b, 0, 0)),
        ),
        compiler_params=pltpu.CompilerParams(
            dimension_semantics=("parallel",),
            vmem_limit_bytes=vmem_limit,
        ),
    )(x_flat, y_flat, w2d, k_mat)

    return out_flat.reshape(n, cout, oh, ow)


def _reference(x, y, weight):
    """Pure-JAX reference: jax.image bilinear (half-pixel == align_corners=False) + 1x1 conv."""
    n, cin, h, w = x.shape
    cout = weight.shape[0]
    xu = jax.image.resize(x, (n, cin, 2 * h, 2 * w), method="bilinear")
    conv = jnp.einsum("oc,nchw->nohw", weight.reshape(cout, cin), xu)
    return conv + y


if __name__ == "__main__":
    # SkipUpSample(in_channels=4, s_factor=4): x has Cin = 4 + 4 = 8, output Cout = 4.
    in_channels, s_factor = 4, 4
    N, H, W = 2, 8, 8
    Cin = in_channels + s_factor
    Cout = in_channels

    key = jax.random.PRNGKey(0)
    kx, ky, kw = jax.random.split(key, 3)
    x = jax.random.normal(kx, (N, Cin, H, W), dtype=jnp.float32)
    y = jax.random.normal(ky, (N, Cout, 2 * H, 2 * W), dtype=jnp.float32)
    # Conv weight for nn.Conv2d(Cin, Cout, 1, bias=False): shape (Cout, Cin, 1, 1).
    weight = jax.random.normal(kw, (Cout, Cin, 1, 1), dtype=jnp.float32) * 0.1

    out = jax.block_until_ready(skip_upsample(x, y, weight))

    ref = _reference(x, y, weight)
    assert out.shape == (N, Cout, 2 * H, 2 * W)
    assert jnp.allclose(out, ref, atol=1e-4, rtol=1e-4)

    print("KERNEL_OK")
</pallas_src>

<mosaic_0001>
module attributes {stable_mosaic.version = 11 : i64} {
  func.func @_skip_upsample_kernel(%arg0: i32, %arg1: memref<1x8x64xf32, #tpu.memory_space<vmem>>, %arg2: memref<1x4x256xf32, #tpu.memory_space<vmem>>, %arg3: memref<4x8xf32, #tpu.memory_space<vmem>>, %arg4: memref<64x256xf32, #tpu.memory_space<vmem>>, %arg5: memref<1x4x256xf32, #tpu.memory_space<vmem>>) attributes {dimension_semantics = [#tpu.dimension_semantics<parallel>], iteration_bounds = array<i64: 2>, scalar_prefetch = 0 : i64, scratch_operands = 0 : i64, tpu.core_type = #tpu.core_type<tc>, window_params = [{transform_indices = @transform_0, window_bounds = array<i64: 1, 8, 64>}, {transform_indices = @transform_1, window_bounds = array<i64: 1, 4, 256>}, {pipeline_mode = #tpu.pipeline_mode<synchronous>, transform_indices = @transform_2, window_bounds = array<i64: 4, 8>}, {pipeline_mode = #tpu.pipeline_mode<synchronous>, transform_indices = @transform_3, window_bounds = array<i64: 64, 256>}, {transform_indices = @transform_4, window_bounds = array<i64: 1, 4, 256>}]} {
    %c0 = arith.constant 0 : index
    %c0_0 = arith.constant 0 : index
    %0 = vector.load %arg3[%c0, %c0_0] : memref<4x8xf32, #tpu.memory_space<vmem>>, vector<4x8xf32>
    %c0_1 = arith.constant 0 : index
    %c0_2 = arith.constant 0 : index
    %c0_3 = arith.constant 0 : index
    %1 = vector.load %arg1[%c0_1, %c0_2, %c0_3] : memref<1x8x64xf32, #tpu.memory_space<vmem>>, vector<1x8x64xf32>
    %2 = vector.shape_cast %1 : vector<1x8x64xf32> to vector<8x64xf32>
    %cst = arith.constant dense<0.000000e+00> : vector<4x64xf32>
    %3 = tpu.matmul %0, %2, %cst {dimension_numbers = #tpu.dot_dimension_numbers<[1], [0], [0], [1], [0, 0, 1, 1], [], []>} : vector<4x8xf32>, vector<8x64xf32>, vector<4x64xf32> -> vector<4x64xf32>
    %c0_4 = arith.constant 0 : index
    %c0_5 = arith.constant 0 : index
    %4 = vector.load %arg4[%c0_4, %c0_5] : memref<64x256xf32, #tpu.memory_space<vmem>>, vector<64x256xf32>
    %cst_6 = arith.constant dense<0.000000e+00> : vector<4x256xf32>
    %5 = tpu.matmul %3, %4, %cst_6 {dimension_numbers = #tpu.dot_dimension_numbers<[1], [0], [0], [1], [0, 0, 1, 1], [], []>} : vector<4x64xf32>, vector<64x256xf32>, vector<4x256xf32> -> vector<4x256xf32>
    %c0_7 = arith.constant 0 : index
    %c0_8 = arith.constant 0 : index
    %c0_9 = arith.constant 0 : index
    %6 = vector.load %arg2[%c0_7, %c0_8, %c0_9] : memref<1x4x256xf32, #tpu.memory_space<vmem>>, vector<1x4x256xf32>
    %7 = vector.shape_cast %6 : vector<1x4x256xf32> to vector<4x256xf32>
    %8 = arith.addf %5, %7 : vector<4x256xf32>
    %c0_10 = arith.constant 0 : index
    %c0_11 = arith.constant 0 : index
    %c0_12 = arith.constant 0 : index
    %9 = vector.load %arg5[%c0_10, %c0_11, %c0_12] : memref<1x4x256xf32, #tpu.memory_space<vmem>>, vector<1x4x256xf32>
    %10 = vector.shape_cast %9 : vector<1x4x256xf32> to vector<4x256xf32>
    %11 = vector.shape_cast %8 : vector<4x256xf32> to vector<1x4x256xf32>
    tpu.vector_store %arg5[%c0_10, %c0_11, %c0_12], %11 {strides = array<i32>} : memref<1x4x256xf32, #tpu.memory_space<vmem>>, vector<1x4x256xf32>,
    return
  }
  func.func @transform_0(%arg0: i32) -> (i32, i32, i32) {
    %c0_i32 = arith.constant 0 : i32
    %c0_i32_0 = arith.constant 0 : i32
    %c0_i32_1 = arith.constant 0 : i32
    return %arg0, %c0_i32, %c0_i32_0 : i32, i32, i32
  }
  func.func @transform_1(%arg0: i32) -> (i32, i32, i32) {
    %c0_i32 = arith.constant 0 : i32
    %c0_i32_0 = arith.constant 0 : i32
    %c0_i32_1 = arith.constant 0 : i32
    return %arg0, %c0_i32, %c0_i32_0 : i32, i32, i32
  }
  func.func @transform_2(%arg0: i32) -> (i32, i32) {
    %c0_i32 = arith.constant 0 : i32
    %c0_i32_0 = arith.constant 0 : i32
    %c0_i32_1 = arith.constant 0 : i32
    return %c0_i32, %c0_i32_0 : i32, i32
  }
  func.func @transform_3(%arg0: i32) -> (i32, i32) {
    %c0_i32 = arith.constant 0 : i32
    %c0_i32_0 = arith.constant 0 : i32
    %c0_i32_1 = arith.constant 0 : i32
    return %c0_i32, %c0_i32_0 : i32, i32
  }
  func.func @transform_4(%arg0: i32) -> (i32, i32, i32) {
    %c0_i32 = arith.constant 0 : i32
    %c0_i32_0 = arith.constant 0 : i32
    %c0_i32_1 = arith.constant 0 : i32
    return %arg0, %c0_i32, %c0_i32_0 : i32, i32, i32
  }
}

</mosaic_0001>

<bundles_post_ra>
// kernel: tpu_custom_call.1
= control target key start
LH: loop header
LB: loop body
LE: loop exit
PB: predicated region body
PF: predicated region fallthrough
CT: control target
= control target key end

     0   :  { %s1023_s0 = inlined_call_operand.hbm [shape: f32[2,8,64], index: 0, kind: input, shape index: {}]   ;;  %s1024_s1 = inlined_call_operand.hbm [shape: f32[2,4,256], index: 1, kind: input, shape index: {}]   ;;  %s1025_s2 = inlined_call_operand.hbm [shape: f32[4,8], index: 2, kind: input, shape index: {}]   ;;  %s1026_s3 = inlined_call_operand.hbm [shape: f32[64,256], index: 3, kind: input, shape index: {}]   ;;  %s1027_s4 = inlined_call_operand.hbm [shape: f32[2,4,256], index: 4, kind: output, shape index: {}]  }
   0x1   :  { %1028 = sst [smem:[#allocation17_spill]] %s1025_s2 }
   0x2   :  { %1029 = sst [smem:[#allocation18_spill]] %s1026_s3 }
   0x3   :  { %9 = vsyncpa [#allocation3], 0 }
   0x4   :  { %11 = vsyncpa [#allocation3 + $0x1], 0 }
   0x5   :  { %12 = vsyncpa [#allocation6], 0 }
   0x6   :  { %14 = vsyncpa [#allocation6 + $0x1], 0 }
   0x7   :  { %15 = vsyncpa [#allocation9], 0 }
   0x8   :  { %16 = vsyncpa [#allocation4], 0 }
   0x9   :  { %18 = vsyncpa [#allocation4 + $0x1], 0  ;;  %s844_s15 = smov 0   ;;  %s846_s16 = smov 0  }
   0xa   :  { %s848_s17 = smov 0   ;;  %s850_s18 = smov 0  }
   0xb LB: > { %s865_s19 = sadd.s32 4294967295, %s813_s18   ;;  %s515_s20 = sadd.s32 4294967294, %s813_s18   ;;  %s813_s18 = sphi %s850_s18, %s1043_s18   ;;  %s809_s17 = sphi %s848_s17, %s1042_s17   ;;  %s805_s16 = sphi %s846_s16, %s1041_s16   ;;  %s801_s15 = sphi %s844_s15, %s1040_s15  }
   0xc   : > { %p44_p0 = scmp.ne.s32.totalorder %s805_s16, %s801_s15  ;;  %p45_p1 = scmp.eq.s32.totalorder %s865_s19, 0 }
   0xd   : > { %p136_p2 = scmp.eq.s32.totalorder %s865_s19, 1  ;;  %p142_p3 = scmp.eq.s32.totalorder %s515_s20, 1 }
   0xe   : > { %p874_p4 = por %p45_p1, %p44_p0  ;;  %p516_p5 = scmp.ge.s32.totalorder %s813_s18, 1 }
   0xf   : > { %p879_p6 = por %p142_p3, %p44_p0  ;;  %p149_p7 = scmp.lt.s32.totalorder %s813_s18, 3 }
  0x10   : > { %s1032_s2 = sld [smem:[#allocation17_spill]]  ;;  %s815_s27 = smov [#allocation7]  }
  0x11   : > { %p887_p8 = pnand %p516_p5, %p149_p7  ;;  %s163_s28 = sshll.u32 %s815_s27, 4  ;;  %s164_s28 = int_to_ptr.vmem [resolvable:$true] %s163_s28 }
  0x12   : > { %s1034_s3 = sld [smem:[#allocation18_spill]]  ;;  %s816_s6 = smov [#allocation8]  }
  0x13   : > { %p555_p10 = pneg %p887_p8  ;;  %s174_s7 = sshll.u32 %s816_s6, 4  ;;  %s175_s7 = int_to_ptr.vmem [resolvable:$true] %s174_s7 }
  0x14   : > { %s817_s8 = smov 256   ;;  %s818_s9 = smov 16  }
  0x15   : > { %p556_p11 = pnand %p555_p10, %p45_p1  ;;  %s900_s10 = sadd.s32 1, %s813_s18  }
  0x16   : > { %s161_s25 = sshll.u32 %s1032_s2, 4  ;;  %s28_s11 = ssub.s32 %s813_s18, %s900_s10  ;;  %s162_s25 = int_to_ptr.hbm [resolvable:$true] %s161_s25 }
  0x17   : > { %558 = dma.hbm_to_vmem [thread:$0]  (!%p556_p11), %s162_s25, 64, %s164_s28, [#allocation6]  }
  0x18   : > { %s172_s5 = sshll.u32 %s1034_s3, 4  ;;  %p29_p12 = scmp.eq.s32.totalorder %s28_s11, 0  ;;  %s173_s5 = int_to_ptr.hbm [resolvable:$true] %s172_s5 }
  0x19   : > { %561 = dma.hbm_to_vmem [thread:$0]  (!%p556_p11), %s173_s5, 2048, %s175_s7, [#allocation9], %s817_s8, %s817_s8, %s818_s9  }
  0x1a   : > { %s31_s12 = sadd.s32 1, %s809_s17  ;;  %p38_p13 = scmp.ne.s32.totalorder %s809_s17, %s805_s16 }
  0x1b   : > { %p39_p0 = scmp.eq.s32.totalorder %s813_s18, 0  ;;  %p575_p7 = scmp.lt.s32.totalorder %s813_s18, 2 }
  0x1c   : > { %s909_s13 = scalar_select %p29_p12, %s809_s17, %s31_s12  }
  0x1d   : > { %p40_p3 = por %p39_p0, %p38_p13  ;;  %p913_p5 = por %p136_p2, %p38_p13 }
  0x1e   : > { %1035 = sst [smem:[#allocation16_spill]] %s909_s13  ;;  %s188_s20 = sand.u32 1, %s809_s17  }
  0x1f   : > { %s919_s23 = sshll.u32 %s188_s20, 3  ;;  %s521_s24 = sshll.u32 %s813_s18, 3 }
  0x20   : > { %s196_s28 = scalar_lea.hbm %s1023_s0, %s521_s24  ;;  %s192_s29 = scalar_lea.vmem [#allocation2], %s919_s23 }
  0x21   : > { %s200_s30 = sshll.u32 %s192_s29, 4  ;;  %s198_s5 = sshll.u32 %s196_s28, 4  ;;  %s201_s30 = int_to_ptr.vmem [resolvable:$true] %s200_s30  ;;  %s199_s5 = int_to_ptr.hbm [resolvable:$true] %s198_s5 }
  0x22   : > { %p926_p10 = pnand %p575_p7, %p40_p3  ;;  %s216_s9 = scalar_lea.hbm %s1024_s1, %s521_s24 }
  0x23   : > { %s207_s11 = sand.u32 1, %s813_s18   ;;  %s189_s12 = scalar_lea.sflag [#allocation3], %s188_s20 }
  0x24   : > { %s675_s2 = sshra.s32 %s199_s5, 4  ;;  %p679_p11 = pneg %p926_p10  ;;  %s676_s2 = int_to_ptr.hbm [resolvable:$true] %s675_s2 }
  0x25   : > { %s677_s25 = scalar_lea.hbm %s676_s2, 8  ;;  %s682_s29 = scalar_lea.hbm %s1023_s0, 16 }
  0x26   : > { %p678_p2 = scmp.ne.s32.totalorder %s676_s2, %s677_s25  ;;  %p683_p0 = scmp.lt.s32.totalorder %s676_s2, %s1023_s0 }
  0x27   : > { %p684_p3 = scmp.lt.s32.totalorder %s682_s29, %s677_s25 }
  0x28   : > { %p680_p12 = pnand %p679_p11, %p678_p2 }
  0x29   : > { %p685_p7 = por %p684_p3, %p683_p0 }
  0x2a   : > { %p681_p13 = pneg %p680_p12 }
  0x2c   : > { %p686_p9 = pnand %p685_p7, %p681_p13 }
  0x2e   : > { %689 = shalt.err (!%p686_p9)
}
  0x2f   : > { %565 = dma.hbm_to_vmem [thread:$0]  (!%p926_p10), %s199_s5, 128, %s201_s30, %s189_s12  }
  0x30   : > { %s218_s20 = sshll.u32 %s216_s9, 4  ;;  %s211_s24 = scalar_lea.vmem [#allocation5], %s919_s23  ;;  %s219_s20 = int_to_ptr.hbm [resolvable:$true] %s218_s20 }
  0x31   : > { %s220_s3 = sshll.u32 %s211_s24, 4  ;;  %s208_s27 = scalar_lea.sflag [#allocation6], %s207_s11  ;;  %s221_s3 = int_to_ptr.vmem [resolvable:$true] %s220_s3 }
  0x32   : > { %s705_s28 = sshra.s32 %s219_s20, 4  ;;  %s712_s29 = scalar_lea.hbm %s1024_s1, 16  ;;  %s706_s28 = int_to_ptr.hbm [resolvable:$true] %s705_s28 }
  0x33   : > { %s707_s13 = scalar_lea.hbm %s706_s28, 8  ;;  %p713_p9 = scmp.lt.s32.totalorder %s706_s28, %s1024_s1 }
  0x34   : > { %p708_p2 = scmp.ne.s32.totalorder %s706_s28, %s707_s13  ;;  %p714_p0 = scmp.lt.s32.totalorder %s712_s29, %s707_s13 }
  0x36   : > { %p710_p12 = pnand %p708_p2, %p679_p11  ;;  %p715_p3 = por %p714_p0, %p713_p9 }
  0x38   : > { %p711_p13 = pneg %p710_p12 }
  0x3a   : > { %p716_p7 = pnand %p715_p3, %p711_p13 }
  0x3c   : > { %719 = shalt.err (!%p716_p7)
}
  0x3d   : > { %568 = dma.hbm_to_vmem [thread:$0]  (!%p926_p10), %s219_s20, 128, %s221_s3, %s208_s27  }
  0x3e   : > { %229 = sbr.rel (%p887_p8) target bundleno = 343 (0x157), region = 36  ;;  %s962_s23 = sand.u32 (!%p887_p8), 1, %s805_s16  }
  0x3f   : > { %s965_s5 = sshll.u32 (!%p887_p8), %s962_s23, 3  ;;  %s232_s9 = scalar_lea.sflag (!%p887_p8), [#allocation3], %s962_s23 }
  0x40   : > { %s235_s13 = scalar_lea.vmem (!%p887_p8), [#allocation2], %s965_s5 }
  0x43   : > { %780 = dma.done.wait (%p874_p4), %s232_s9, 128  }
  0x44   : > { %782 = vsyncadd (%p874_p4), %s232_s9, 4294967168  ;;  %s241_s3 = sand.u32 1, %s865_s19   ;;  %s245_s6 = scalar_lea.vmem [#allocation5], %s965_s5 }
  0x45   : > { %s242_s26 = scalar_lea.sflag [#allocation6], %s241_s3 }
  0x46   : > { %784 = dma.done.wait (%p874_p4), %s242_s26, 128  }
  0x47   : > { %786 = vsyncadd (%p874_p4), %s242_s26, 4294967168 }
  0x48   : > { %788 = dma.done.wait (%p45_p1), [#allocation6], 64  }
  0x49   : > { %790 = vsyncadd (%p45_p1), [#allocation6], 4294967232 }
  0x4a   : > { %792 = dma.done.wait (%p45_p1), [#allocation9], 2048  }
  0x4b   : > { %794 = vsyncadd (%p45_p1), [#allocation9], 4294965248  ;;  %vm288_vm0 = vcmask 64512   ;;  %v287_v0 = vld [vmem:[%s235_s13] sm:$0xff]  ;;  %v326_v2 = vld [vmem:[#allocation8 + $0x70] sm:$0xff]  ;;  %vm335_vm1 = vcmask 523264  }
  0x4c   : > { %v286_v1 = vld [vmem:[#allocation7] sm:$0xf]  ;;  %307 = vmatpush.msra.mxu0 %v287_v0  ;;  %347 = vmatpush.msra.mxu1 %v326_v2  ;;  %v324_v4 = vld [vmem:[#allocation8 + $0x60] sm:$0xff]  ;;  %v325_v5 = vld [vmem:[#allocation8 + $0x68] sm:$0xff]  ;;  %s540_s21 = sshll.u32 %s865_s19, 3  ;;  %s285_s20 = scalar_lea.vmem [#allocation10], %s965_s5 }
  0x4d   : > { %v327_v3 = vld [vmem:[#allocation8 + $0x78] sm:$0xff]  ;;  %531 = vmatmul.msk.f32.vlgmr.msra.gmra.mxu0 %vm288_vm0, %v286_v1  ;;  %v322_v6 = vld [vmem:[#allocation8 + $0x50] sm:$0xff]  ;;  %v320_v8 = vld [vmem:[#allocation8 + $0x40] sm:$0xff]  ;;  %s398_s8 = scalar_lea.hbm %s1027_s4, %s540_s21  ;;  %s400_s24 = sshll.u32 %s285_s20, 4  ;;  %vm382_vm2 = vcmask 1043456   ;;  %s401_s24 = int_to_ptr.vmem [resolvable:$true] %s400_s24 }
  0x4e   : > { %367 = vmatpush.msra.mxu2 %v327_v3  ;;  %348 = vmatpush.msra.mxu1 %v324_v4  ;;  %v323_v7 = vld [vmem:[#allocation8 + $0x58] sm:$0xff]  ;;  %v321_v9 = vld [vmem:[#allocation8 + $0x48] sm:$0xff]  ;;  %v318_v10 = vld [vmem:[#allocation8 + $0x30] sm:$0xff]  ;;  %s402_s27 = sshll.u32 %s398_s8, 4  ;;  %s387_s19 = scalar_lea.sflag [#allocation4], %s962_s23  ;;  %s403_s27 = int_to_ptr.hbm [resolvable:$true] %s402_s27 }
  0x4f   : > { %v319_v11 = vld [vmem:[#allocation8 + $0x38] sm:$0xff]  ;;  %v316_v12 = vld [vmem:[#allocation8 + $0x20] sm:$0xff]  ;;  %v317_v13 = vld [vmem:[#allocation8 + $0x28] sm:$0xff]  ;;  %s749_s28 = sshra.s32 %s403_s27, 4  ;;  %s755_s7 = scalar_lea.hbm %s1027_s4, 16  ;;  %s750_s28 = int_to_ptr.hbm [resolvable:$true] %s749_s28 }
  0x50   : > { %368 = vmatpush.msra.mxu2 %v325_v5  ;;  %349 = vmatpush.msra.mxu1 %v322_v6  ;;  %v314_v14 = vld [vmem:[#allocation8 + $0x10] sm:$0xff]  ;;  %v315_v15 = vld [vmem:[#allocation8 + $0x18] sm:$0xff]  ;;  %v312_v16 = vld [vmem:[#allocation8] sm:$0xff]  ;;  %s751_s2 = scalar_lea.hbm %s750_s28, 8  ;;  %p756_p10 = scmp.lt.s32.totalorder %s750_s28, %s1027_s4 }
  0x51   : > { %v313_v17 = vld [vmem:[#allocation8 + $0x8] sm:$0xff]  ;;  %p752_p1 = scmp.ne.s32.totalorder %s750_s28, %s751_s2  ;;  %p757_p11 = scmp.lt.s32.totalorder %s755_s7, %s751_s2 }
  0x52   : > { %369 = vmatpush.msra.mxu2 %v323_v7  ;;  %350 = vmatpush.msra.mxu1 %v320_v8  ;;  %v328_v18 = vld [vmem:[%s245_s6] sm:$0xff] }
  0x53   : > { %330 = vst [vmem:[#allocation1] ss:$2 sm:$0xff] %v328_v18  ;;  %p753_p4 = pnand %p752_p1, %p913_p5  ;;  %p758_p2 = por %p757_p11, %p756_p10 }
  0x54   : > { %370 = vmatpush.msra.mxu2 %v321_v9  ;;  %351 = vmatpush.msra.mxu1 %v318_v10 }
  0x55   : > { %p754_p8 = pneg %p753_p4 }
  0x56   : > { %371 = vmatpush.msra.mxu2 %v319_v11  ;;  %352 = vmatpush.msra.mxu1 %v316_v12 }
  0x57   : > { %p759_p12 = pnand %p758_p2, %p754_p8 }
  0x58   : > { %372 = vmatpush.msra.mxu2 %v317_v13  ;;  %353 = vmatpush.msra.mxu1 %v314_v14 }
  0x5a   : > { %373 = vmatpush.msra.mxu2 %v315_v15  ;;  %354 = vmatpush.msra.mxu1 %v312_v16  ;;  %v332_v20 = vld.sshfl [vmem:[#allocation1 + $0x8] sm:$0xff pattern:$0x75316420]  ;;  %v331_v21 = vld.sshfl [vmem:[#allocation1] sm:$0xff pattern:$0x75316420] }
  0x5c   : > { %374 = vmatpush.msra.mxu2 %v313_v17 }
  0xca   : > { %v309_v19 = vpop.f32.mrf.mxu0 }
  0xcb   : > { %532 = vmatmul.msk.f32.vlgmr.msra.gmra.mxu1 %vm335_vm1, %v309_v19  ;;  %533 = vmatmul.msk.f32.vlgmr.msra.gmra.mxu2 %vm335_vm1, %v309_v19 }
 0x148   : > { %v356_v22 = vpop.f32.mrf.mxu1 }
 0x149   : > { %v357_v25 = vadd.f32 %v356_v22, %v331_v21 }
 0x14e   : > { %v376_v23 = vpop.f32.mrf.mxu2 }
 0x14f   : > { %v377_v24 = vadd.f32 %v376_v23, %v332_v20 }
 0x151   : > { %v381_v26 = vrot.slane %v377_v24, 4 }
 0x153   : > { %v383_v27 = vsel %vm382_vm2, %v357_v25, %v381_v26 }
 0x154   : > { %385 = vst [vmem:[%s285_s20] sm:$0xff] %v383_v27 }
 0x155   : > { %762 = shalt.err (!%p759_p12)
}
 0x156   : > { %553 = dma.vmem_to_hbm [thread:$0]  (%p913_p5), %s401_s24, 128, %s403_s27, %s387_s19  }
 0x157 PF: > { %s414_s23 = sand.u32 1, %s801_s15   ;;  %p1038_p13 = scmp.ge.s32.totalorder %s813_s18, 2 }
 0x158   : > { %s415_s9 = scalar_lea.sflag [#allocation4], %s414_s23 }
 0x159   : > { %p570_p9 = pnand %p1038_p13, %p879_p6 }
 0x15b   : > { %p571_p0 = pneg %p570_p9 }
 0x15d   : > { %796 = dma.done.wait (%p571_p0), %s415_s9, 128  }
 0x15e   : > { %798 = vsyncadd (%p571_p0), %s415_s9, 4294967168  ;;  %s1039_s13 = sld [smem:[#allocation16_spill]]  ;;  %p21_p3 = scmp.ge.s32.totalorder %s900_s10, 4  }
 0x15f   : > { %s1040_s15 = smov %s805_s16  ;;  %s1041_s16 = smov %s809_s17 }
 0x160   : > { %s1043_s18 = smov %s900_s10  ;;  %23 = sbr.rel (!%p21_p3) target bundleno = 11 (0xb), region = 102 }
 0x164   : > { %s1042_s17 = smov %s1039_s13 }
 0x165   :  { %421 = vsyncpa [#allocation3], 1 }
 0x166   :  { %423 = vsyncpa [#allocation3 + $0x1], 1 }
 0x167   :  { %424 = vsyncpa [#allocation6], 1 }
 0x168   :  { %426 = vsyncpa [#allocation6 + $0x1], 1 }
 0x169   :  { %427 = vsyncpa [#allocation9], 1 }
 0x16a   :  { %428 = vsyncpa [#allocation4], 1 }
 0x16b   :  { %430 = vsyncpa [#allocation4 + $0x1], 1 }

</bundles_post_ra>
